<compile_context>
chip_gen: v7x
topology: tpu7x:2x2x1
jax: 0.10.0
libtpu: 0.0.40
codegen_flags: <defaults>
</compile_context>

<pallas_src>
import numpy as np
import jax
import jax.numpy as jnp
from jax.experimental import pallas as pl
from jax.experimental.pallas import tpu as pltpu


# ----------------------------------------------------------------------------
# Noise schedule glue (mirrors Diffusion.make_beta_schedule / set_new_noise_schedule,
# 'linear' schedule)
# ----------------------------------------------------------------------------
def make_schedule(n_timestep, linear_start=1e-4, linear_end=2e-2,
                  p2_loss_weight_gamma=0.0, p2_loss_weight_k=1.0):
    betas = np.linspace(linear_start, linear_end, n_timestep, dtype=np.float64)
    alphas = 1.0 - betas
    alphas_cumprod = np.cumprod(alphas, axis=0)
    return dict(
        sqrt_alphas_cumprod=jnp.asarray(np.sqrt(alphas_cumprod), jnp.float32),
        sqrt_one_minus_alphas_cumprod=jnp.asarray(np.sqrt(1.0 - alphas_cumprod),
                                                  jnp.float32),
        p2_loss_weight=jnp.asarray(
            (p2_loss_weight_k + alphas_cumprod / (1.0 - alphas_cumprod))
            ** (-p2_loss_weight_gamma), jnp.float32),
        num_timesteps=n_timestep,
    )


# ----------------------------------------------------------------------------
# Pallas kernel: fused q-sample + x-branch denoiser matmul + p2-weighted MSE.
# One grid step, one MXU push, one cross-lane reduce.
# ----------------------------------------------------------------------------
def diffusion_loss_kernel(scales_ref,  # VMEM (3, B*HW): rows = sa, s1, p2w/(C*HW*B)
                          x_ref,       # VMEM (C, B*HW)  x_start
                          noise_ref,   # VMEM (C, B*HW)  noise
                          base_ref,    # VMEM (C, B*HW)  cond conv + bias + t/T*time_w
                          wxt_ref,     # VMEM (C, C)     x-branch 1x1-conv weight (out, in)
                          loss_ref):   # VMEM (1, 1)     scalar loss
    sc = scales_ref[...]
    sa = sc[0:1, :]           # (1, B*HW) -> sublane-broadcast against (C, B*HW)
    s1 = sc[1:2, :]
    p2w = sc[2:3, :]          # p2 weight with 1/(C*HW*B) pre-folded

    # q-sample: x_noisy = sqrt(alpha_cumprod)[t]*x + sqrt(1-alpha_cumprod)[t]*noise
    x_noisy = sa * x_ref[...] + s1 * noise_ref[...]                      # (C, B*HW)

    # synthetic denoiser: shared 1x1-conv over channels, whole batch in one
    # lane-dense MXU push; noise-independent branch pre-folded into base_ref.
    pred = base_ref[...] + jnp.dot(wxt_ref[...], x_noisy,
                                   preferred_element_type=jnp.float32)   # (C, B*HW)

    d = noise_ref[...] - pred
    loss_ref[...] = jnp.zeros_like(loss_ref) + jnp.sum(p2w * (d * d))


def diffusion_p_losses(x_start, condition_x, noise, t, sched, params):
    """Pallas forward: returns the scalar loss (== Diffusion.forward / p_losses)."""
    B, C, H, W = x_start.shape
    Cc = condition_x.shape[1]
    HW = H * W
    N = B * HW

    def to_lane_slab(a, ch):  # (B, ch, H, W) -> (ch, B*HW), B*HW on lanes
        return a.reshape(B, ch, HW).transpose(1, 0, 2).reshape(ch, N).astype(jnp.float32)

    x_l = to_lane_slab(x_start, C)
    n_l = to_lane_slab(noise, C)
    c_l = condition_x.reshape(B, Cc, HW).astype(jnp.float32)

    # Per-batch schedule scalars (the `extract(...)` gathers), broadcast to a
    # (3, B*HW) lane table.  The per-sample mean 1/(C*H*W) and batch mean 1/B
    # are pre-folded into the p2 row — no in-kernel divides.
    sa = sched['sqrt_alphas_cumprod'][t]
    s1 = sched['sqrt_one_minus_alphas_cumprod'][t]
    p2w = sched['p2_loss_weight'][t] / float(C * HW * B)
    scales = jnp.stack([jnp.repeat(sa, HW),
                        jnp.repeat(s1, HW),
                        jnp.repeat(p2w, HW)]).astype(jnp.float32)          # (3, B*HW)

    # Noise-independent part of the synthetic denoiser, pre-folded into one
    # tensor: cond-branch 1x1 conv + bias + (t/T)*time_w, laid out as (C, B*HW).
    t_norm = t.astype(jnp.float32) / sched['num_timesteps']
    base = (jnp.einsum('io,bih->boh', params['w_cond'], c_l)
            + params['bias'][0][None, :, None]
            + t_norm[:, None, None] * params['time_w'][0][None, :, None])  # (B, C, HW)
    base_l = base.transpose(1, 0, 2).reshape(C, N).astype(jnp.float32)

    wxt = params['w_x'].T.astype(jnp.float32)                              # (C_out, C_in)

    out = pl.pallas_call(
        diffusion_loss_kernel,
        out_shape=jax.ShapeDtypeStruct((1, 1), jnp.float32),
        in_specs=[
            pl.BlockSpec(memory_space=pltpu.MemorySpace.VMEM),   # scales
            pl.BlockSpec(memory_space=pltpu.MemorySpace.VMEM),   # x
            pl.BlockSpec(memory_space=pltpu.MemorySpace.VMEM),   # noise
            pl.BlockSpec(memory_space=pltpu.MemorySpace.VMEM),   # base
            pl.BlockSpec(memory_space=pltpu.MemorySpace.VMEM),   # wxt
        ],
        out_specs=pl.BlockSpec(memory_space=pltpu.MemorySpace.VMEM),
    )(scales, x_l, n_l, base_l, wxt)
    return out[0, 0]


# ----------------------------------------------------------------------------
# Pure-JAX reference (for correctness check)
# ----------------------------------------------------------------------------
def reference_loss(x_start, condition_x, noise, t, sched, params):
    B, C, H, W = x_start.shape
    sa = sched['sqrt_alphas_cumprod'][t][:, None, None, None]
    s1 = sched['sqrt_one_minus_alphas_cumprod'][t][:, None, None, None]
    x_noisy = sa * x_start + s1 * noise
    xin = jnp.concatenate([condition_x, x_noisy], axis=1)        # (B, Cc+C, H, W)
    w_full = jnp.concatenate([params['w_cond'], params['w_x']], axis=0)
    xin_l = jnp.transpose(xin, (0, 2, 3, 1))
    pred = jnp.einsum('bhwi,ic->bhwc', xin_l, w_full) + params['bias'][0]
    t_norm = (t.astype(jnp.float32) / sched['num_timesteps'])[:, None, None, None]
    pred = pred + t_norm * params['time_w'][0]
    pred = jnp.transpose(pred, (0, 3, 1, 2))                     # NCHW
    loss = (noise - pred) ** 2
    loss = loss.reshape(B, -1).mean(axis=1)                      # 'b ... -> b (...)' + mean
    loss = loss * sched['p2_loss_weight'][t]
    return loss.mean()


# ----------------------------------------------------------------------------
if __name__ == "__main__":
    # TODO(synk): the original Diffusion wraps an arbitrary user-supplied denoiser
    # network; a deterministic synthetic 1x1-conv + time-bias denoiser stands in.
    B, C, Cc, H, W = 2, 4, 4, 16, 16
    num_timesteps = 10

    key = jax.random.PRNGKey(0)
    k_x, k_cond, k_noise, k_t, k_wc, k_wx, k_b, k_tw = jax.random.split(key, 8)

    x_start = jax.random.normal(k_x, (B, C, H, W), jnp.float32)
    condition_x = jax.random.normal(k_cond, (B, Cc, H, W), jnp.float32)
    noise = jax.random.normal(k_noise, (B, C, H, W), jnp.float32)        # torch.randn_like
    t = jax.random.randint(k_t, (B,), 0, num_timesteps)                  # torch.randint

    params = dict(
        w_cond=0.1 * jax.random.normal(k_wc, (Cc, C), jnp.float32),
        w_x=0.1 * jax.random.normal(k_wx, (C, C), jnp.float32),
        bias=0.05 * jax.random.normal(k_b, (1, C), jnp.float32),
        time_w=0.05 * jax.random.normal(k_tw, (1, C), jnp.float32),
    )

    sched = make_schedule(num_timesteps)

    loss_pallas = jax.block_until_ready(
        diffusion_p_losses(x_start, condition_x, noise, t, sched, params))
    loss_ref = jax.block_until_ready(
        reference_loss(x_start, condition_x, noise, t, sched, params))

    assert np.allclose(np.asarray(loss_pallas), np.asarray(loss_ref),
                       rtol=1e-4, atol=1e-5), (loss_pallas, loss_ref)
    print("KERNEL_OK")
</pallas_src>

<mosaic_0001>
module attributes {stable_mosaic.version = 11 : i64} {
  func.func @diffusion_loss_kernel(%arg0: memref<3x512xf32, #tpu.memory_space<vmem>>, %arg1: memref<4x512xf32, #tpu.memory_space<vmem>>, %arg2: memref<4x512xf32, #tpu.memory_space<vmem>>, %arg3: memref<4x512xf32, #tpu.memory_space<vmem>>, %arg4: memref<4x4xf32, #tpu.memory_space<vmem>>, %arg5: memref<1x1xf32, #tpu.memory_space<vmem>>) attributes {dimension_semantics = [], scalar_prefetch = 0 : i64, scratch_operands = 0 : i64, tpu.core_type = #tpu.core_type<tc>} {
    %c0 = arith.constant 0 : index
    %c0_0 = arith.constant 0 : index
    %0 = vector.load %arg0[%c0, %c0_0] : memref<3x512xf32, #tpu.memory_space<vmem>>, vector<3x512xf32>
    %1 = vector.extract_strided_slice %0 {offsets = [0, 0], sizes = [1, 512], strides = [1, 1]} : vector<3x512xf32> to vector<1x512xf32>
    %2 = vector.extract_strided_slice %0 {offsets = [1, 0], sizes = [1, 512], strides = [1, 1]} : vector<3x512xf32> to vector<1x512xf32>
    %3 = vector.extract_strided_slice %0 {offsets = [2, 0], sizes = [1, 512], strides = [1, 1]} : vector<3x512xf32> to vector<1x512xf32>
    %c0_1 = arith.constant 0 : index
    %c0_2 = arith.constant 0 : index
    %4 = vector.load %arg1[%c0_1, %c0_2] : memref<4x512xf32, #tpu.memory_space<vmem>>, vector<4x512xf32>
    %5 = vector.broadcast %1 : vector<1x512xf32> to vector<4x512xf32>
    %6 = arith.mulf %5, %4 : vector<4x512xf32>
    %c0_3 = arith.constant 0 : index
    %c0_4 = arith.constant 0 : index
    %7 = vector.load %arg2[%c0_3, %c0_4] : memref<4x512xf32, #tpu.memory_space<vmem>>, vector<4x512xf32>
    %8 = vector.broadcast %2 : vector<1x512xf32> to vector<4x512xf32>
    %9 = arith.mulf %8, %7 : vector<4x512xf32>
    %10 = arith.addf %6, %9 : vector<4x512xf32>
    %c0_5 = arith.constant 0 : index
    %c0_6 = arith.constant 0 : index
    %11 = vector.load %arg3[%c0_5, %c0_6] : memref<4x512xf32, #tpu.memory_space<vmem>>, vector<4x512xf32>
    %c0_7 = arith.constant 0 : index
    %c0_8 = arith.constant 0 : index
    %12 = vector.load %arg4[%c0_7, %c0_8] : memref<4x4xf32, #tpu.memory_space<vmem>>, vector<4x4xf32>
    %cst = arith.constant dense<0.000000e+00> : vector<4x512xf32>
    %13 = tpu.matmul %12, %10, %cst {dimension_numbers = #tpu.dot_dimension_numbers<[1], [0], [0], [1], [0, 0, 1, 1], [], []>} : vector<4x4xf32>, vector<4x512xf32>, vector<4x512xf32> -> vector<4x512xf32>
    %14 = arith.addf %11, %13 : vector<4x512xf32>
    %c0_9 = arith.constant 0 : index
    %c0_10 = arith.constant 0 : index
    %15 = vector.load %arg2[%c0_9, %c0_10] : memref<4x512xf32, #tpu.memory_space<vmem>>, vector<4x512xf32>
    %16 = arith.subf %15, %14 : vector<4x512xf32>
    %cst_11 = arith.constant 0.000000e+00 : f32
    %17 = vector.broadcast %cst_11 : f32 to vector<1x1xf32>
    %18 = arith.mulf %16, %16 : vector<4x512xf32>
    %19 = vector.broadcast %3 : vector<1x512xf32> to vector<4x512xf32>
    %20 = arith.mulf %19, %18 : vector<4x512xf32>
    %21 = vector.shape_cast %20 : vector<4x512xf32> to vector<1x4x512xf32>
    %cst_12 = arith.constant dense<0.000000e+00> : vector<1xf32>
    %22 = vector.multi_reduction <add>, %21, %cst_12 [1, 2] : vector<1x4x512xf32> to vector<1xf32>
    %23 = vector.shape_cast %22 : vector<1xf32> to vector<1x1x1xf32>
    %24 = vector.extract %23[0, 0, 0] : f32 from vector<1x1x1xf32>
    %25 = vector.broadcast %24 : f32 to vector<1x1xf32>
    %26 = arith.addf %17, %25 : vector<1x1xf32>
    %c0_13 = arith.constant 0 : index
    %c0_14 = arith.constant 0 : index
    %27 = vector.load %arg5[%c0_13, %c0_14] : memref<1x1xf32, #tpu.memory_space<vmem>>, vector<1x1xf32>
    tpu.vector_store %arg5[%c0_13, %c0_14], %26 {strides = array<i32>} : memref<1x1xf32, #tpu.memory_space<vmem>>, vector<1x1xf32>,
    return
  }
}

</mosaic_0001>

<bundles_post_ra>
// kernel: tpu_custom_call.1
= control target key start
LH: loop header
LB: loop body
LE: loop exit
PB: predicated region body
PF: predicated region fallthrough
CT: control target
= control target key end

     0   :  { %10 = vsyncpa [#allocation3], 0  ;;  %s690_s0 = inlined_call_operand.hbm [shape: f32[3,512], index: 0, kind: input, shape index: {}]   ;;  %s691_s1 = inlined_call_operand.hbm [shape: f32[4,512], index: 1, kind: input, shape index: {}]   ;;  %s692_s2 = inlined_call_operand.hbm [shape: f32[4,512], index: 2, kind: input, shape index: {}]   ;;  %s693_s3 = inlined_call_operand.hbm [shape: f32[4,512], index: 3, kind: input, shape index: {}]   ;;  %s694_s4 = inlined_call_operand.vmem [shape: f32[4,4], index: 4, kind: input, shape index: {}]   ;;  %s695_s5 = inlined_call_operand.hbm [shape: f32[1,1], index: 5, kind: output, shape index: {}]  }
   0x1   :  { %11 = vsyncpa [#allocation6], 0 }
   0x2   :  { %12 = vsyncpa [#allocation9], 0 }
   0x3   :  { %13 = vsyncpa [#allocation4], 0  ;;  %s567_s18 = smov [#allocation5]   ;;  %s568_s20 = smov [#allocation2]  }
   0x4   :  { %s30_s19 = sshll.u32 %s567_s18, 4  ;;  %s20_s21 = sshll.u32 %s568_s20, 4  ;;  %s31_s19 = int_to_ptr.vmem [resolvable:$true] %s30_s19  ;;  %s21_s21 = int_to_ptr.vmem [resolvable:$true] %s20_s21 }
   0x5   :  { %s449_s24 = scalar_lea.hbm %s691_s1, 256 }
   0x6   :  { %p450_p0 = scmp.ne.s32.totalorder %s691_s1, %s449_s24  ;;  %p453_p1 = scmp.lt.u32.totalorder %s449_s24, %s691_s1 }
   0x8   :  { %p455_p2 = pnand %p453_p1, %p450_p0 }
   0xa   :  { %458 = shalt.err (!%p455_p2)
}
   0xb   :  { %s459_s29 = scalar_lea.vmem %s31_s19, 256  ;;  %p464_p4 = scmp.lt.s32.totalorder %s31_s19, %s31_s19 }
   0xc   :  { %p460_p3 = scmp.ne.s32.totalorder %s31_s19, %s459_s29  ;;  %p465_p5 = scmp.lt.s32.totalorder %s459_s29, %s459_s29 }
   0xe   :  { %p466_p6 = por %p465_p5, %p464_p4 }
  0x10   :  { %p467_p7 = pnand %p466_p6, %p460_p3 }
  0x12   :  { %470 = shalt.err (!%p467_p7)
}
  0x13   :  { %33 = dma.hbm_to_vmem [thread:$0]  %s691_s1, 256, %s31_s19, [#allocation6]  }
  0x14   :  { %s471_s9 = scalar_lea.hbm %s690_s0, 256 }
  0x15   :  { %p472_p8 = scmp.ne.s32.totalorder %s690_s0, %s471_s9  ;;  %p475_p9 = scmp.lt.u32.totalorder %s471_s9, %s690_s0 }
  0x17   :  { %p477_p10 = pnand %p475_p9, %p472_p8 }
  0x19   :  { %480 = shalt.err (!%p477_p10)
}
  0x1a   :  { %s481_s14 = scalar_lea.vmem %s21_s21, 256  ;;  %p486_p12 = scmp.lt.s32.totalorder %s21_s21, %s21_s21 }
  0x1b   :  { %p482_p11 = scmp.ne.s32.totalorder %s21_s21, %s481_s14  ;;  %p487_p13 = scmp.lt.s32.totalorder %s481_s14, %s481_s14 }
  0x1d   :  { %p488_p0 = por %p487_p13, %p486_p12 }
  0x1f   :  { %p489_p1 = pnand %p488_p0, %p482_p11 }
  0x21   :  { %492 = shalt.err (!%p489_p1)
}
  0x22   :  { %23 = dma.hbm_to_vmem [thread:$0]  %s690_s0, 256, %s21_s21, [#allocation3]  }
  0x23   :  { %s569_s16 = smov [#allocation7]   ;;  %s570_s18 = smov [#allocation8]  }
  0x24   :  { %s40_s17 = sshll.u32 %s569_s16, 4  ;;  %s50_s19 = sshll.u32 %s570_s18, 4  ;;  %s41_s17 = int_to_ptr.vmem [resolvable:$true] %s40_s17  ;;  %s51_s19 = int_to_ptr.vmem [resolvable:$true] %s50_s19 }
  0x25   :  { %s493_s23 = scalar_lea.hbm %s692_s2, 256 }
  0x26   :  { %p494_p2 = scmp.ne.s32.totalorder %s692_s2, %s493_s23  ;;  %p497_p3 = scmp.lt.u32.totalorder %s493_s23, %s692_s2 }
  0x28   :  { %p499_p4 = pnand %p497_p3, %p494_p2 }
  0x2a   :  { %502 = shalt.err (!%p499_p4)
}
  0x2b   :  { %s503_s0 = scalar_lea.vmem %s41_s17, 256  ;;  %p508_p6 = scmp.lt.s32.totalorder %s41_s17, %s41_s17 }
  0x2c   :  { %p504_p5 = scmp.ne.s32.totalorder %s41_s17, %s503_s0  ;;  %p509_p7 = scmp.lt.s32.totalorder %s503_s0, %s503_s0 }
  0x2e   :  { %p510_p8 = por %p509_p7, %p508_p6 }
  0x30   :  { %p511_p9 = pnand %p510_p8, %p504_p5 }
  0x32   :  { %514 = shalt.err (!%p511_p9)
}
  0x33   :  { %43 = dma.hbm_to_vmem [thread:$0]  %s692_s2, 256, %s41_s17, [#allocation6]  }
  0x34   :  { %s515_s6 = scalar_lea.hbm %s693_s3, 256 }
  0x35   :  { %p516_p10 = scmp.ne.s32.totalorder %s693_s3, %s515_s6  ;;  %p519_p11 = scmp.lt.u32.totalorder %s515_s6, %s693_s3 }
  0x37   :  { %p521_p12 = pnand %p519_p11, %p516_p10 }
  0x39   :  { %524 = shalt.err (!%p521_p12)
}
  0x3a   :  { %s525_s11 = scalar_lea.vmem %s51_s19, 256  ;;  %p530_p0 = scmp.lt.s32.totalorder %s51_s19, %s51_s19 }
  0x3b   :  { %p526_p13 = scmp.ne.s32.totalorder %s51_s19, %s525_s11  ;;  %p531_p1 = scmp.lt.s32.totalorder %s525_s11, %s525_s11 }
  0x3d   :  { %p532_p2 = por %p531_p1, %p530_p0 }
  0x3f   :  { %p533_p3 = pnand %p532_p2, %p526_p13 }
  0x41   :  { %536 = shalt.err (!%p533_p3)
}
  0x42   :  { %53 = dma.hbm_to_vmem [thread:$0]  %s693_s3, 256, %s51_s19, [#allocation9]  }
  0x43   :  { %559 = dma.done.wait [#allocation3], 256  }
  0x44   :  { %560 = vsyncadd [#allocation3], 4294967040 }
  0x45   :  { %561 = dma.done.wait [#allocation6], 512  }
  0x46   :  { %562 = vsyncadd [#allocation6], 4294966784 }
  0x47   :  { %563 = dma.done.wait [#allocation9], 256  }
  0x48   :  { %564 = vsyncadd [#allocation9], 4294967040  ;;  %v74_v0 = vlaneseq  ;;  %v571_v1 = vmov 0.0   ;;  %v657_v7 = vld [vmem:[#allocation2] sm:$0x77]  ;;  %v70_v8 = vld [vmem:[#allocation5] sm:$0xff] }
  0x49   :  { %256 = vmatprep.mubr.f32.mxu0 %v571_v1  ;;  %327 = vmatprep.mubr.f32.mxu1 %v571_v1  ;;  %v120_v9 = vld [vmem:[#allocation7] sm:$0xff]  ;;  %vm179_vm0 = vcmask 1043456   ;;  %v112_v11 = vcombine.high %v70_v8, %v70_v8  ;;  %v69_v14 = vld [vmem:[#allocation2 + $0x8] sm:$0x77]  ;;  %v71_v15 = vld [vmem:[#allocation5 + $0x8] sm:$0xff]  ;;  %vm175_vm1 = vcmask 31744  }
  0x4a   :  { %v651_v2 = vshrl.u32 %v74_v0, 7  ;;  %v160_v13 = vcombine.high %v120_v9, %v120_v9  ;;  %v113_v19 = vcombine.high %v71_v15, %v71_v15  ;;  %v121_v20 = vld [vmem:[#allocation7 + $0x8] sm:$0xff]  ;;  %v174_v41 = vld [vmem:[%s694_s4] sm:$0xf]  ;;  %v172_v49 = vld [vmem:[#allocation8] sm:$0xff]  ;;  %s572_s4 = smov [#allocation10]  }
  0x4b   :  { %v161_v24 = vcombine.high %v121_v20, %v121_v20  ;;  %v173_v55 = vld [vmem:[#allocation8 + $0x8] sm:$0xff]  ;;  %s420_s14 = sshll.u32 %s572_s4, 4  ;;  %vm412_vm2 = vcmask 0   ;;  %s421_s14 = int_to_ptr.vmem [resolvable:$true] %s420_s14 }
  0x4c   :  { %v80_v3 = vsub.s32 4, %v651_v2  ;;  %v128_v4 = vsub.s32 5, %v651_v2  ;;  %v76_v5 = vsub.s32 0, %v651_v2  ;;  %v124_v6 = vsub.s32 1, %v651_v2  ;;  %s537_s15 = scalar_lea.vmem %s421_s14, 16  ;;  %s541_s16 = scalar_lea.vmem %s421_s14, 32 }
  0x4d   :  { %v350_v46 = vsub.s32 2, %v651_v2  ;;  %v354_v48 = vsub.s32 6, %v651_v2  ;;  %p538_p4 = scmp.ne.s32.totalorder %s421_s14, %s537_s15  ;;  %p542_p5 = scmp.lt.s32.totalorder %s421_s14, %s421_s14 }
  0x4e   :  { %v81_v10 = vrot.slane %v657_v7, %v80_v3  ;;  %v129_v12 = vrot.slane %v657_v7, %v128_v4  ;;  %v77_v16 = vrot.slane %v657_v7, %v76_v5  ;;  %v125_v17 = vrot.slane %v657_v7, %v124_v6  ;;  %p543_p6 = scmp.lt.s32.totalorder %s541_s16, %s537_s15 }
  0x4f   :  { %v89_v18 = vrot.slane %v69_v14, %v80_v3  ;;  %v137_v23 = vrot.slane %v69_v14, %v128_v4  ;;  %v85_v28 = vrot.slane %v69_v14, %v76_v5  ;;  %v133_v32 = vrot.slane %v69_v14, %v124_v6 }
  0x50   :  { %v101_v21 = vrot.slane %v81_v10, %v76_v5  ;;  %v149_v22 = vrot.slane %v129_v12, %v124_v6  ;;  %v97_v25 = vrot.slane %v77_v16, %v76_v5  ;;  %v145_v26 = vrot.slane %v125_v17, %v124_v6  ;;  %p544_p7 = por %p543_p6, %p542_p5 }
  0x51   :  { %v109_v27 = vrot.slane %v89_v18, %v76_v5  ;;  %v157_v31 = vrot.slane %v137_v23, %v124_v6  ;;  %v105_v36 = vrot.slane %v85_v28, %v76_v5  ;;  %v153_v39 = vrot.slane %v133_v32, %v124_v6 }
  0x52   :  { %v117_v29 = vmul.f32 %v112_v11, %v101_v21  ;;  %v165_v30 = vmul.f32 %v160_v13, %v149_v22  ;;  %v116_v33 = vmul.f32 %v97_v25, %v70_v8  ;;  %v164_v34 = vmul.f32 %v145_v26, %v120_v9  ;;  %p545_p8 = pnand %p544_p7, %p538_p4 }
  0x53   :  { %v119_v35 = vmul.f32 %v113_v19, %v109_v27  ;;  %v167_v38 = vmul.f32 %v161_v24, %v157_v31  ;;  %v118_v42 = vmul.f32 %v105_v36, %v71_v15  ;;  %v166_v44 = vmul.f32 %v153_v39, %v121_v20 }
  0x54   :  { %v169_v37 = vadd.f32 %v165_v30, %v117_v29  ;;  %v168_v40 = vadd.f32 %v164_v34, %v116_v33  ;;  %v351_v52 = vrot.slane %v657_v7, %v350_v46  ;;  %v355_v57 = vrot.slane %v657_v7, %v354_v48 }
  0x55   :  { %v171_v43 = vadd.f32 %v167_v38, %v119_v35  ;;  %v170_v45 = vadd.f32 %v166_v44, %v118_v42  ;;  %v359_v59 = vrot.slane %v69_v14, %v350_v46  ;;  %v363_v63 = vrot.slane %v69_v14, %v354_v48 }
  0x56   :  { %431 = vmatprep.subr.msk.mxu0 %vm179_vm0, %v169_v37  ;;  %v371_v61 = vrot.slane %v351_v52, %v350_v46  ;;  %v375_v1 = vrot.slane %v355_v57, %v350_v46 }
  0x57   :  { %432 = vmatpush1.msk.msra.mxu0 %vm179_vm0, %v168_v40  ;;  %434 = vmatprep.subr.msk.mxu1 %vm179_vm0, %v171_v43  ;;  %v379_v3 = vrot.slane %v359_v59, %v350_v46  ;;  %v383_v8 = vrot.slane %v363_v63, %v350_v46 }
  0x58   :  { %433 = vmatmul.mubr.msk.f32.vlgmr.msra.gmra.mrb[0].mxu0 %vm175_vm1, %v174_v41  ;;  %435 = vmatpush1.msk.msra.mxu1 %vm179_vm0, %v170_v45 }
  0x59   :  { %436 = vmatmul.mubr.msk.f32.vlgmr.msra.gmra.mrb[0].mxu1 %vm175_vm1, %v174_v41 }
 0x12b   :  { %v258_v47 = vpop.f32.mrb[0].mxu0 }
 0x12c   :  { %v260_v50 = vpop.f32.mrb[1].mxu0  ;;  %v329_v53 = vpop.f32.mrb[0].mxu1 }
 0x12d   :  { %v338_v51 = vcombine.low %v258_v47, %v260_v50  ;;  %v331_v56 = vpop.f32.mrb[1].mxu1 }
 0x12e   :  { %v339_v58 = vcombine.low %v329_v53, %v331_v56 }
 0x12f   :  { %v342_v54 = vadd.f32 %v338_v51, %v172_v49 }
 0x130   :  { %v343_v62 = vadd.f32 %v339_v58, %v173_v55 }
 0x131   :  { %v344_v60 = vsub.f32 %v120_v9, %v342_v54 }
 0x132   :  { %v345_v2 = vsub.f32 %v121_v20, %v343_v62 }
 0x133   :  { %v346_v0 = vmul.f32 %v344_v60, %v344_v60 }
 0x134   :  { %v347_v6 = vmul.f32 %v345_v2, %v345_v2 }
 0x135   :  { %v386_v4 = vcombine.high %v346_v0, %v346_v0  ;;  %v390_v5 = vmul.f32 %v371_v61, %v346_v0 }
 0x136   :  { %v387_v11 = vcombine.high %v347_v6, %v347_v6  ;;  %v392_v12 = vmul.f32 %v379_v3, %v347_v6 }
 0x137   :  { %v391_v10 = vmul.f32 %v386_v4, %v375_v1  ;;  %v394_v13 = vsel %vm179_vm0, %v390_v5, 0.0 }
 0x138   :  { %v393_v15 = vmul.f32 %v387_v11, %v383_v8  ;;  %v397_v16 = vsel %vm179_vm0, %v392_v12, 0.0 }
 0x139   :  { %v395_v7 = vsel %vm179_vm0, %v391_v10, 0.0 }
 0x13a   :  { %v396_v9 = vadd.f32 %v395_v7, %v394_v13  ;;  %v399_v17 = vsel %vm179_vm0, %v393_v15, 0.0 }
 0x13c   :  { %v398_v14 = vadd.f32 %v397_v16, %v396_v9 }
 0x13e   :  { %v400_v18 = vadd.f32 %v399_v17, %v398_v14 }
 0x140   :  { %401 = vadd.xlane.f32.xlu0 %v400_v18 }
 0x1cd   :  { %v402_v19 = vpop.xlane.xlu0 %401 }
 0x1ce   :  { %v403_v20 = vrot.slane %v402_v19, 4 }
 0x1d0   :  { %v404_v21 = vadd.f32 %v403_v20, %v402_v19 }
 0x1d2   :  { %v405_v22 = vrot.slane %v404_v21, 2 }
 0x1d4   :  { %v406_v23 = vadd.f32 %v405_v22, %v404_v21 }
 0x1d6   :  { %v407_v24 = vrot.slane %v406_v23, 1 }
 0x1d8   :  { %v408_v25 = vadd.f32 %v407_v24, %v406_v23 }
 0x1da   :  { %437 = vpush %v408_v25 }
 0x20b   :  { %s438_s1 = spop %437 }
 0x20c   :  { %v410_v26 = vstv %s438_s1 }
 0x20d   :  { %413 = vst.msk [vmem:[#allocation10] sm:$0x1] %vm412_vm2, %v410_v26 }
 0x20e   :  { %548 = shalt.err (!%p545_p8)
}
 0x20f   :  { %s549_s19 = scalar_lea.hbm %s695_s5, 16 }
 0x210   :  { %p550_p9 = scmp.ne.s32.totalorder %s695_s5, %s549_s19  ;;  %p553_p10 = scmp.lt.u32.totalorder %s549_s19, %s695_s5 }
 0x212   :  { %p555_p11 = pnand %p553_p10, %p550_p9 }
 0x214   :  { %558 = shalt.err (!%p555_p11)
}
 0x215   :  { %423 = dma.vmem_to_hbm [thread:$0]  %s421_s14, 16, %s695_s5, [#allocation4]  }
 0x216   :  { %565 = dma.done.wait [#allocation4], 16  }
 0x217   :  { %566 = vsyncadd [#allocation4], 4294967280 }
 0x218   :  { %427 = vsyncpa [#allocation3], 1 }
 0x219   :  { %428 = vsyncpa [#allocation6], 1 }
 0x21a   :  { %429 = vsyncpa [#allocation9], 1 }
 0x21b   :  { %430 = vsyncpa [#allocation4], 1 }

</bundles_post_ra>
